<compile_context>
chip_gen: v7x
topology: tpu7x:2x2x1
jax: 0.10.0
libtpu: 0.0.40
codegen_flags: <defaults>
</compile_context>

<pallas_src>
import functools

import jax
import jax.numpy as jnp
from jax import lax
from jax.experimental import pallas as pl
from jax.experimental.pallas import tpu as pltpu

BN_EPS = 1e-5
_LANE = 128
_SUBLANE = 8       # f32 sublane
_ROW_ALIGN = 16    # bf16 sublane packing -> keep row tiles multiples of 16


def _round_up(a, b):
    return (a + b - 1) // b * b


def _cdiv(a, b):
    return (a + b - 1) // b


def _physical_vmem_bytes():
    """Per-core physical VMEM (trace-time query), conservative fallback if unavailable."""
    try:
        info = pltpu.get_tpu_info()
        cap = getattr(info, "vmem_capacity_bytes", None)
        if cap:
            return int(cap)
    except Exception:
        pass
    return 64 * 1024 * 1024  # v7x per-core VMEM (smallest across v5e/v6e/v7x)


# --------------- Pass 1: conv-as-matmul + per-tile BN partial statistics ---------------
def conv_matmul_stats_kernel(xp_ref, w_ref, y_ref, stats_ref):
    """xp_ref:    (TM, K_pad)    bf16 im2col patch tile
       w_ref:     (K_pad, C_pad) bf16 weight matrix (whole, constant across the grid)
       y_ref:     (TM, C_pad)    bf16 conv output tile (f32 MXU accumulation, cast on store)
       stats_ref: (8, C_pad)     f32; row 0 = sum(y), row 1 = sum(y*y) over this tile
    """
    y = jnp.dot(xp_ref[...], w_ref[...], preferred_element_type=jnp.float32)
    y_ref[...] = y.astype(y_ref.dtype)
    s = jnp.sum(y, axis=0, keepdims=True)
    sq = jnp.sum(y * y, axis=0, keepdims=True)
    pad = jnp.zeros((_SUBLANE - 2, y.shape[1]), jnp.float32)
    stats_ref[...] = jnp.concatenate([s, sq, pad], axis=0)


def im2col_nhwc(x, kh, kw, stride, padding, dilation, dtype):
    """x: (N, C, H, W) -> patches (N*Hout*Wout, kh*kw*C), kernel-position-major /
    channel-minor ordering, built from NHWC shifted slabs (no large transpose)."""
    N, C, H, W = x.shape
    Hout = (H + 2 * padding - dilation * (kh - 1) - 1) // stride + 1
    Wout = (W + 2 * padding - dilation * (kw - 1) - 1) // stride + 1
    # One input-sized NCHW->NHWC transpose (cheap, done once, already in bf16); the
    # kh*kw-replicated matrix below is pure shifted slices + a channel-axis concat.
    x_nhwc = jnp.transpose(x.astype(dtype), (0, 2, 3, 1))
    x_p = jnp.pad(x_nhwc, ((0, 0), (padding, padding), (padding, padding), (0, 0)))
    slabs = []
    for i in range(kh):
        for j in range(kw):
            hi = i * dilation
            wi = j * dilation
            slabs.append(x_p[:, hi:hi + stride * Hout:stride,
                             wi:wi + stride * Wout:stride, :])
    p = jnp.concatenate(slabs, axis=-1)                 # (N, Hout, Wout, kh*kw*C)
    return p.reshape(N * Hout * Wout, kh * kw * C), Hout, Wout


def basic_conv2d_forward(x, weight, gamma, beta, *, stride=1, padding=0, dilation=1,
                         tile_m=1024, compute_dtype=jnp.bfloat16):
    """Equivalent of BasicConv2d.forward (conv(bias=False) -> training-mode BN, no ReLU).

    x:      (N, C_in, H, W)        f32 NCHW
    weight: (C_out, C_in, kh, kw)  PyTorch conv weight layout (groups=1)
    gamma, beta: (C_out,)          BatchNorm2d affine params
    returns (N, C_out, Hout, Wout) f32 NCHW
    """
    N, C_in, H, W = x.shape
    C_out, w_cin, kh, kw = weight.shape
    assert w_cin == C_in, "groups != 1 not supported"
    # TODO(synk): grouped conv (groups > 1) would need per-group matmuls / block-diag weight.

    xp, Hout, Wout = im2col_nhwc(x, kh, kw, stride, padding, dilation, compute_dtype)
    M, K = xp.shape

    K_pad = _round_up(K, _LANE)
    C_pad = _round_up(C_out, _LANE)

    # ---- Row-tile size: bf16-sublane aligned; >= 2 tiles when possible (v7x megacore);
    # shrink if the double-buffered blocks would not fit in VMEM. ----
    M_sub = _round_up(M, _ROW_ALIGN)
    TM = _round_up(min(tile_m, M_sub), _ROW_ALIGN)
    if M_sub >= 2 * _ROW_ALIGN:
        TM = min(TM, _round_up(_cdiv(M_sub, 2), _ROW_ALIGN))

    vmem_cap = _physical_vmem_bytes() - 8 * 1024 * 1024

    def _buffer_bytes(tm):
        return (2 * tm * K_pad * 2              # xp: double-buffered bf16
                + 1 * K_pad * C_pad * 2         # weight: single-buffered bf16
                + 2 * tm * C_pad * 2            # y out: double-buffered bf16
                + 2 * _SUBLANE * C_pad * 4)     # stats out: double-buffered f32

    while _buffer_bytes(TM) + 4 * 1024 * 1024 > vmem_cap and TM > _ROW_ALIGN:
        TM = max(_ROW_ALIGN, _round_up(TM // 2, _ROW_ALIGN))
    # TODO(synk): for very large K (e.g. 3x3 with C_in >= 1024 on v7x 64 MiB VMEM) add a K
    # grid axis ("arbitrary", last) with an f32 accumulator scratch instead of shrinking TM
    # (BN stats then emitted only on the final K step).

    M_pad = _round_up(M, TM)
    nM = M_pad // TM
    vmem_limit = int(min(max(_buffer_bytes(TM) + 8 * 1024 * 1024, 16 * 1024 * 1024),
                         vmem_cap))

    # Zero-padded, lane-aligned bf16 operands (zero rows/cols contribute 0 to sum/sumsq).
    xp_p = jnp.pad(xp, ((0, M_pad - M), (0, K_pad - K)))
    # Weight rows reordered to (kh, kw, C_in)-major to match the NHWC patch ordering.
    w_mat = jnp.transpose(weight, (2, 3, 1, 0)).reshape(kh * kw * C_in, C_out)
    w_p = jnp.pad(w_mat.astype(compute_dtype), ((0, K_pad - K), (0, C_pad - C_out)))

    cparams = pltpu.CompilerParams(
        dimension_semantics=("parallel",),
        vmem_limit_bytes=vmem_limit,
    )

    # ---- Pass 1 (Pallas): Y = Xp @ W tiled over M, plus per-tile partial BN stats ----
    y_pad, stats = pl.pallas_call(
        conv_matmul_stats_kernel,
        out_shape=(jax.ShapeDtypeStruct((M_pad, C_pad), compute_dtype),
                   jax.ShapeDtypeStruct((nM * _SUBLANE, C_pad), jnp.float32)),
        grid_spec=pltpu.PrefetchScalarGridSpec(
            num_scalar_prefetch=0,
            grid=(nM,),
            in_specs=[
                pl.BlockSpec((TM, K_pad), lambda i: (i, 0)),
                # Constant block across the grid -> single-buffer it to free VMEM.
                pl.BlockSpec((K_pad, C_pad), lambda i: (0, 0),
                             pipeline_mode=pl.Buffered(buffer_count=1)),
            ],
            out_specs=(
                pl.BlockSpec((TM, C_pad), lambda i: (i, 0)),
                pl.BlockSpec((_SUBLANE, C_pad), lambda i: (i, 0)),
            ),
        ),
        compiler_params=cparams,
    )(xp_p, w_p)

    # ---- Cross-tile stat combine + fold gamma/beta (tiny, plain JAX) ----
    stats = stats.reshape(nM, _SUBLANE, C_pad)[:, :2, :C_out]
    sum_y = jnp.sum(stats[:, 0, :], axis=0)
    sum_sq = jnp.sum(stats[:, 1, :], axis=0)
    inv_m = 1.0 / float(M)                        # divide by true M (pad rows are zero)
    mean = sum_y * inv_m
    var = sum_sq * inv_m - mean * mean            # biased variance (training-mode BN)
    # TODO(synk): for extremely large M use a compensated / Welford-style combine.
    inv_std = lax.rsqrt(var + BN_EPS)
    scale = gamma.astype(jnp.float32) * inv_std
    shift = beta.astype(jnp.float32) - mean * scale

    # ---- BN apply fused by XLA into the single slice + NHWC->NCHW output copy ----
    y = y_pad[:M, :C_out].astype(jnp.float32)
    out = (y * scale + shift).reshape(N, Hout, Wout, C_out).transpose(0, 3, 1, 2)
    return out


def reference_forward(x, weight, gamma, beta, *, stride=1, padding=0, dilation=1,
                      conv_dtype=jnp.float32, precision=None):
    """Pure-JAX reference: conv2d (no bias) + training-mode BatchNorm2d."""
    y = lax.conv_general_dilated(
        x.astype(conv_dtype), weight.astype(conv_dtype),
        window_strides=(stride, stride),
        padding=[(padding, padding), (padding, padding)],
        rhs_dilation=(dilation, dilation),
        dimension_numbers=("NCHW", "OIHW", "NCHW"),
        preferred_element_type=jnp.float32,
        precision=precision,
    )
    mean = y.mean(axis=(0, 2, 3), keepdims=True)
    var = ((y - mean) ** 2).mean(axis=(0, 2, 3), keepdims=True)  # biased
    yhat = (y - mean) * lax.rsqrt(var + BN_EPS)
    return yhat * gamma.reshape(1, -1, 1, 1) + beta.reshape(1, -1, 1, 1)


if __name__ == "__main__":
    # Small shapes consistent with BasicConv2d(4, 8, kernel_size=3, padding=1).
    N, C_in, H, W = 2, 4, 16, 16
    C_out, kh, kw = 8, 3, 3
    stride, padding, dilation = 1, 1, 1

    key = jax.random.PRNGKey(0)
    kx, kw_, kg, kb = jax.random.split(key, 4)
    x = jax.random.normal(kx, (N, C_in, H, W), dtype=jnp.float32)
    weight = jax.random.normal(kw_, (C_out, C_in, kh, kw), dtype=jnp.float32) * 0.1
    gamma = jax.random.normal(kg, (C_out,), dtype=jnp.float32) * 0.1 + 1.0
    beta = jax.random.normal(kb, (C_out,), dtype=jnp.float32) * 0.1

    # tile_m=128 so this toy problem (M = 2*16*16 = 512 rows) exercises the multi-tile
    # path (nM = 4) including the cross-tile BN stat combine; real shapes should use the
    # default tile_m=1024 (the VMEM-fit loop shrinks it automatically when needed).
    fwd = jax.jit(functools.partial(basic_conv2d_forward, stride=stride, padding=padding,
                                    dilation=dilation, tile_m=128))
    out = jax.block_until_ready(fwd(x, weight, gamma, beta))
    assert out.shape == (N, C_out, H, W), out.shape

    # Matched-precision reference (bf16 conv inputs, f32 accumulation). Tolerance allows
    # for the bf16 storage of the conv intermediate (intentional, per perf review).
    ref_bf16 = reference_forward(x, weight, gamma, beta, stride=stride, padding=padding,
                                 dilation=dilation, conv_dtype=jnp.bfloat16)
    err_bf16 = float(jnp.max(jnp.abs(out - ref_bf16)))
    assert jnp.allclose(out, ref_bf16, atol=2e-2, rtol=2e-2), err_bf16

    # Full-f32 reference: loose tolerance. The bf16 MXU feed + bf16 intermediate is the
    # intended fast path; callers expecting exact f32-conv parity should not use it.
    ref_f32 = reference_forward(x, weight, gamma, beta, stride=stride, padding=padding,
                                dilation=dilation, conv_dtype=jnp.float32,
                                precision=lax.Precision.HIGHEST)
    err_f32 = float(jnp.max(jnp.abs(out - ref_f32)))
    assert jnp.allclose(out, ref_f32, atol=7.5e-2, rtol=7.5e-2), err_f32

    print("KERNEL_OK")
</pallas_src>

<mosaic_0001>
module attributes {stable_mosaic.version = 11 : i64} {
  func.func @conv_matmul_stats_kernel(%arg0: i32, %arg1: memref<128x128xbf16, #tpu.memory_space<vmem>>, %arg2: memref<128x128xbf16, #tpu.memory_space<vmem>>, %arg3: memref<128x128xbf16, #tpu.memory_space<vmem>>, %arg4: memref<8x128xf32, #tpu.memory_space<vmem>>) attributes {dimension_semantics = [#tpu.dimension_semantics<parallel>], iteration_bounds = array<i64: 4>, scalar_prefetch = 0 : i64, scratch_operands = 0 : i64, tpu.core_type = #tpu.core_type<tc>, window_params = [{transform_indices = @transform_0, window_bounds = array<i64: 128, 128>}, {pipeline_mode = #tpu.pipeline_mode<synchronous>, transform_indices = @transform_1, window_bounds = array<i64: 128, 128>}, {transform_indices = @transform_2, window_bounds = array<i64: 128, 128>}, {transform_indices = @transform_3, window_bounds = array<i64: 8, 128>}]} {
    %c0 = arith.constant 0 : index
    %c0_0 = arith.constant 0 : index
    %0 = vector.load %arg1[%c0, %c0_0] : memref<128x128xbf16, #tpu.memory_space<vmem>>, vector<128x128xbf16>
    %c0_1 = arith.constant 0 : index
    %c0_2 = arith.constant 0 : index
    %1 = vector.load %arg2[%c0_1, %c0_2] : memref<128x128xbf16, #tpu.memory_space<vmem>>, vector<128x128xbf16>
    %cst = arith.constant dense<0.000000e+00> : vector<128x128xf32>
    %2 = tpu.matmul %0, %1, %cst {dimension_numbers = #tpu.dot_dimension_numbers<[1], [0], [0], [1], [0, 0, 1, 1], [], []>} : vector<128x128xbf16>, vector<128x128xbf16>, vector<128x128xf32> -> vector<128x128xf32>
    %3 = arith.truncf %2 : vector<128x128xf32> to vector<128x128xbf16>
    %c0_3 = arith.constant 0 : index
    %c0_4 = arith.constant 0 : index
    %4 = vector.load %arg3[%c0_3, %c0_4] : memref<128x128xbf16, #tpu.memory_space<vmem>>, vector<128x128xbf16>
    tpu.vector_store %arg3[%c0_3, %c0_4], %3 {strides = array<i32>} : memref<128x128xbf16, #tpu.memory_space<vmem>>, vector<128x128xbf16>,
    %cst_5 = arith.constant dense<0.000000e+00> : vector<128xf32>
    %5 = vector.multi_reduction <add>, %2, %cst_5 [0] : vector<128x128xf32> to vector<128xf32>
    %6 = vector.shape_cast %5 : vector<128xf32> to vector<1x128xf32>
    %7 = arith.mulf %2, %2 : vector<128x128xf32>
    %cst_6 = arith.constant dense<0.000000e+00> : vector<128xf32>
    %8 = vector.multi_reduction <add>, %7, %cst_6 [0] : vector<128x128xf32> to vector<128xf32>
    %9 = vector.shape_cast %8 : vector<128xf32> to vector<1x128xf32>
    %cst_7 = arith.constant 0.000000e+00 : f32
    %10 = vector.broadcast %cst_7 : f32 to vector<6x128xf32>
    %11 = tpu.concatenate %6, %9, %10 in 0 : vector<1x128xf32>, vector<1x128xf32>, vector<6x128xf32> -> vector<8x128xf32>
    %c0_8 = arith.constant 0 : index
    %c0_9 = arith.constant 0 : index
    %12 = vector.load %arg4[%c0_8, %c0_9] : memref<8x128xf32, #tpu.memory_space<vmem>>, vector<8x128xf32>
    tpu.vector_store %arg4[%c0_8, %c0_9], %11 {strides = array<i32>} : memref<8x128xf32, #tpu.memory_space<vmem>>, vector<8x128xf32>,
    return
  }
  func.func @transform_0(%arg0: i32) -> (i32, i32) {
    %c0_i32 = arith.constant 0 : i32
    %c0_i32_0 = arith.constant 0 : i32
    return %arg0, %c0_i32 : i32, i32
  }
  func.func @transform_1(%arg0: i32) -> (i32, i32) {
    %c0_i32 = arith.constant 0 : i32
    %c0_i32_0 = arith.constant 0 : i32
    %c0_i32_1 = arith.constant 0 : i32
    return %c0_i32, %c0_i32_0 : i32, i32
  }
  func.func @transform_2(%arg0: i32) -> (i32, i32) {
    %c0_i32 = arith.constant 0 : i32
    %c0_i32_0 = arith.constant 0 : i32
    return %arg0, %c0_i32 : i32, i32
  }
  func.func @transform_3(%arg0: i32) -> (i32, i32) {
    %c0_i32 = arith.constant 0 : i32
    %c0_i32_0 = arith.constant 0 : i32
    return %arg0, %c0_i32 : i32, i32
  }
}

</mosaic_0001>

<bundles_post_ra>
// kernel: basic_conv2d_forward.1
= control target key start
LH: loop header
LB: loop body
LE: loop exit
PB: predicated region body
PF: predicated region fallthrough
CT: control target
= control target key end

     0   :  { %s864_s12 = smov 0   ;;  %s940_s0 = inlined_call_operand.vmem [shape: bf16[512,128], index: 0, kind: input, shape index: {}]   ;;  %s941_s1 = inlined_call_operand.vmem [shape: bf16[128,128], index: 1, kind: input, shape index: {}]   ;;  %s942_s2 = inlined_call_operand.vmem [shape: bf16[512,128], index: 2, kind: output, shape index: {0}]   ;;  %s943_s3 = inlined_call_operand.vmem [shape: f32[32,128], index: 3, kind: output, shape index: {1}]  }
   0x1 LB: > { %s870_s13 = sadd.s32 4294967295, %s842_s12   ;;  %p645_p0 = scmp.ge.s32.totalorder %s842_s12, 1  ;;  %s842_s12 = sphi %s864_s12, %s14_s12  }
   0x2   : > { %p141_p1 = scmp.lt.s32.totalorder %s842_s12, 5 }
   0x4   : > { %p142_p2 = pnand %p645_p0, %p141_p1 }
   0x5   : > { %v820_v0 = vld [vmem:[%s941_s1] sm:$0xff] (!%p142_p2)   ;;  %s646_s16 = sshll.u32 (!%p142_p2), %s870_s13, 4  ;;  %v821_v1 = vld [vmem:[%s941_s1 + $0x8] sm:$0xff] (!%p142_p2)   ;;  %v822_v2 = vld [vmem:[%s941_s1 + $0x10] sm:$0xff] (!%p142_p2)   ;;  %p181_p4 = scmp.lt.s32.totalorder (!%p142_p2), %s870_s13, 3  ;;  %vm549_vm0 = vcmask (!%p142_p2), 1040384  }
   0x6   : > { %145 = sbr.rel (%p142_p2) target bundleno = 300 (0x12c), region = 28  ;;  %p170_p3 = scmp.lt.s32.totalorder (!%p142_p2), %s646_s16, 63  ;;  %764 = vmatprep.subr.bf16.mxu0 (!%p142_p2), %v820_v0  ;;  %796 = vmatprep.subr.bf16.mxu1 (!%p142_p2), %v820_v0  ;;  %v823_v3 = vld [vmem:[%s941_s1 + $0x18] sm:$0xff] (!%p142_p2)   ;;  %v824_v5 = vld [vmem:[%s941_s1 + $0x20] sm:$0xff] (!%p142_p2)   ;;  %v825_v7 = vld [vmem:[%s941_s1 + $0x28] sm:$0xff] (!%p142_p2)   ;;  %vm551_vm1 = vcmask (!%p142_p2), 1041408  }
   0x7   : > { %765 = vmatpush3.bf16.msra.mxu0 (!%p142_p2), %v820_v0  ;;  %804 = vmatpush3.bf16.msra.mxu1 (!%p142_p2), %v820_v0  ;;  %v826_v8 = vld [vmem:[%s941_s1 + $0x30] sm:$0xff] (!%p142_p2)   ;;  %v827_v9 = vld [vmem:[%s941_s1 + $0x38] sm:$0xff] (!%p142_p2)  }
   0x8   : > { %766 = vmatprep.subr.bf16.mxu0 (!%p142_p2), %v821_v1  ;;  %797 = vmatprep.subr.bf16.mxu1 (!%p142_p2), %v821_v1 }
   0xb   : > { %767 = vmatpush3.bf16.msra.mxu0 (!%p142_p2), %v821_v1  ;;  %805 = vmatpush3.bf16.msra.mxu1 (!%p142_p2), %v821_v1 }
   0xc   : > { %768 = vmatprep.subr.bf16.mxu0 (!%p142_p2), %v822_v2  ;;  %798 = vmatprep.subr.bf16.mxu1 (!%p142_p2), %v822_v2 }
   0xd   : > { %s945_s16 = smov (!%p170_p3, %s646_s16), 63  ;;  %s947_s13 = smov (!%p181_p4, %s870_s13), 3 }
   0xe   : > { %s647_s21 = sshll.u32 %s945_s16, 2  ;;  %s650_s11 = sshll.u32 %s947_s13, 3 }
   0xf   : > { %s892_s24 = scalar_lea.vmem %s940_s0, %s647_s21  ;;  %769 = vmatpush3.bf16.msra.mxu0 %v822_v2  ;;  %806 = vmatpush3.bf16.msra.mxu1 %v822_v2  ;;  %s922_s10 = scalar_lea.vmem %s942_s2, %s647_s21 }
  0x10   : > { %v828_v4 = vld [vmem:[%s892_s24] sm:$0xff]   ;;  %770 = vmatprep.subr.bf16.mxu0 %v823_v3  ;;  %799 = vmatprep.subr.bf16.mxu1 %v823_v3  ;;  %v829_v10 = vld [vmem:[%s892_s24 + $0x8] sm:$0xff]   ;;  %v830_v12 = vld [vmem:[%s892_s24 + $0x10] sm:$0xff]   ;;  %s184_s16 = scalar_lea.vmem %s943_s3, %s650_s11 }
  0x11   : > { %780 = vmatprep.mubr.bf16.mxu0 %v828_v4  ;;  %v832_v6 = vld [vmem:[%s892_s24 + $0x20] sm:$0xff]   ;;  %v833_v11 = vld [vmem:[%s892_s24 + $0x28] sm:$0xff]   ;;  %v834_v13 = vld [vmem:[%s892_s24 + $0x30] sm:$0xff]  }
  0x12   : > { %788 = vmatprep.mubr.bf16.mxu1 %v832_v6  ;;  %v831_v14 = vld [vmem:[%s892_s24 + $0x18] sm:$0xff]  }
  0x13   : > { %771 = vmatpush3.bf16.msra.mxu0 %v823_v3  ;;  %807 = vmatpush3.bf16.msra.mxu1 %v823_v3  ;;  %v835_v15 = vld [vmem:[%s892_s24 + $0x38] sm:$0xff]  }
  0x14   : > { %772 = vmatprep.subr.bf16.mxu0 %v824_v5  ;;  %800 = vmatprep.subr.bf16.mxu1 %v824_v5 }
  0x17   : > { %773 = vmatpush3.bf16.msra.mxu0 %v824_v5  ;;  %808 = vmatpush3.bf16.msra.mxu1 %v824_v5 }
  0x18   : > { %774 = vmatprep.subr.bf16.mxu0 %v825_v7  ;;  %801 = vmatprep.subr.bf16.mxu1 %v825_v7 }
  0x1b   : > { %775 = vmatpush3.bf16.msra.mxu0 %v825_v7  ;;  %809 = vmatpush3.bf16.msra.mxu1 %v825_v7 }
  0x1c   : > { %776 = vmatprep.subr.bf16.mxu0 %v826_v8  ;;  %802 = vmatprep.subr.bf16.mxu1 %v826_v8 }
  0x1f   : > { %777 = vmatpush3.bf16.msra.mxu0 %v826_v8  ;;  %810 = vmatpush3.bf16.msra.mxu1 %v826_v8 }
  0x20   : > { %778 = vmatprep.subr.bf16.mxu0 %v827_v9  ;;  %803 = vmatprep.subr.bf16.mxu1 %v827_v9 }
  0x23   : > { %779 = vmatpush3.bf16.msra.mxu0 %v827_v9  ;;  %811 = vmatpush3.bf16.msra.mxu1 %v827_v9 }
  0x26   : > { %781 = vmatmul.mubr.bf16.vlgmr.msra.gmra.mrb[0].mxu0 %v829_v10  ;;  %789 = vmatmul.mubr.bf16.vlgmr.msra.gmra.mrb[0].mxu1 %v833_v11 }
  0x27   : > { %784 = vmatprep.mubr.bf16.mxu0 %v830_v12  ;;  %792 = vmatprep.mubr.bf16.mxu1 %v834_v13 }
  0x2e   : > { %785 = vmatmul.mubr.bf16.gmra.mrb[4].mxu0 %v831_v14  ;;  %793 = vmatmul.mubr.bf16.gmra.mrb[4].mxu1 %v835_v15 }
  0xf9   : > { %v782_v16 = vpop.f32.mrb[0].mxu0  ;;  %v790_v17 = vpop.f32.mrb[0].mxu1 }
  0xfa   : > { %v348_v18 = vpop.f32.mrb[1].mxu0  ;;  %v380_v19 = vpop.f32.mrb[1].mxu1  ;;  %v514_v31 = vmul.f32 %v782_v16, %v782_v16  ;;  %v522_v3 = vmul.f32 %v790_v17, %v790_v17 }
  0xfb   : > { %v783_v20 = vpop.f32.mrb[2].mxu0  ;;  %v791_v21 = vpop.f32.mrb[2].mxu1  ;;  %v512_v22 = vmul.f32 %v348_v18, %v348_v18  ;;  %v520_v61 = vmul.f32 %v380_v19, %v380_v19 }
  0xfc   : > { %v709_v23 = vpack.c.bf16 %v783_v20, %v782_v16  ;;  %v351_v24 = vpop.f32.mrb[3].mxu0  ;;  %v729_v25 = vpack.c.bf16 %v791_v21, %v790_v17  ;;  %v383_v26 = vpop.f32.mrb[3].mxu1  ;;  %v515_v34 = vmul.f32 %v783_v20, %v783_v20  ;;  %v523_v6 = vmul.f32 %v791_v21, %v791_v21 }
  0xfd   : > { %v704_v27 = vpack.c.bf16 %v351_v24, %v348_v18  ;;  %v491_v28 = vadd.f32 %v351_v24, %v348_v18  ;;  %v513_v29 = vmul.f32 %v351_v24, %v351_v24  ;;  %v724_v30 = vpack.c.bf16 %v383_v26, %v380_v19 }
  0xfe   : > { %741 = vst [vmem:[%s922_s10 + $0x8] sm:$0xff] %v709_v23   ;;  %745 = vst [vmem:[%s922_s10 + $0x28] sm:$0xff] %v729_v25   ;;  %v521_v2 = vmul.f32 %v383_v26, %v383_v26 }
  0xff   : > { %705 = vst [vmem:[%s922_s10] sm:$0xff] %v704_v27   ;;  %v492_v32 = vadd.f32 %v782_v16, %v491_v28  ;;  %v528_v33 = vadd.f32 %v513_v29, %v512_v22  ;;  %744 = vst [vmem:[%s922_s10 + $0x20] sm:$0xff] %v724_v30  }
 0x101   : > { %v529_v35 = vadd.f32 %v528_v33, %v514_v31  ;;  %v786_v36 = vpop.f32.mrb[4].mxu0  ;;  %v493_v37 = vadd.f32 %v783_v20, %v492_v32  ;;  %v794_v38 = vpop.f32.mrb[4].mxu1 }
 0x102   : > { %v364_v39 = vpop.f32.mrb[5].mxu0  ;;  %v396_v40 = vpop.f32.mrb[5].mxu1  ;;  %v518_v55 = vmul.f32 %v786_v36, %v786_v36  ;;  %v526_v15 = vmul.f32 %v794_v38, %v794_v38 }
 0x103   : > { %v494_v41 = vadd.f32 %v493_v37, %v364_v39  ;;  %v516_v42 = vmul.f32 %v364_v39, %v364_v39  ;;  %v530_v43 = vadd.f32 %v529_v35, %v515_v34  ;;  %v787_v44 = vpop.f32.mrb[6].mxu0  ;;  %v795_v45 = vpop.f32.mrb[6].mxu1  ;;  %v524_v9 = vmul.f32 %v396_v40, %v396_v40 }
 0x104   : > { %v719_v46 = vpack.c.bf16 %v787_v44, %v786_v36  ;;  %v367_v47 = vpop.f32.mrb[7].mxu0  ;;  %v739_v48 = vpack.c.bf16 %v795_v45, %v794_v38  ;;  %v399_v49 = vpop.f32.mrb[7].mxu1  ;;  %v519_v58 = vmul.f32 %v787_v44, %v787_v44 }
 0x105   : > { %v531_v50 = vadd.f32 %v530_v43, %v516_v42  ;;  %v714_v51 = vpack.c.bf16 %v367_v47, %v364_v39  ;;  %v495_v52 = vadd.f32 %v494_v41, %v367_v47  ;;  %v517_v53 = vmul.f32 %v367_v47, %v367_v47 }
 0x106   : > { %743 = vst [vmem:[%s922_s10 + $0x18] sm:$0xff] %v719_v46   ;;  %747 = vst [vmem:[%s922_s10 + $0x38] sm:$0xff] %v739_v48   ;;  %v734_v54 = vpack.c.bf16 %v399_v49, %v396_v40  ;;  %v525_v14 = vmul.f32 %v399_v49, %v399_v49 }
 0x107   : > { %742 = vst [vmem:[%s922_s10 + $0x10] sm:$0xff] %v714_v51   ;;  %v496_v56 = vadd.f32 %v786_v36, %v495_v52  ;;  %v532_v57 = vadd.f32 %v531_v50, %v517_v53 }
 0x108   : > { %746 = vst [vmem:[%s922_s10 + $0x30] sm:$0xff] %v734_v54  }
 0x109   : > { %v533_v59 = vadd.f32 %v532_v57, %v518_v55  ;;  %v497_v60 = vadd.f32 %v787_v44, %v496_v56 }
 0x10b   : > { %v498_v62 = vadd.f32 %v497_v60, %v380_v19  ;;  %v534_v63 = vadd.f32 %v533_v59, %v519_v58  ;;  %v527_v19 = vmul.f32 %v795_v45, %v795_v45 }
 0x10d   : > { %v535_v0 = vadd.f32 %v534_v63, %v520_v61  ;;  %v499_v1 = vadd.f32 %v498_v62, %v383_v26 }
 0x10f   : > { %v500_v4 = vadd.f32 %v790_v17, %v499_v1  ;;  %v536_v5 = vadd.f32 %v535_v0, %v521_v2 }
 0x111   : > { %v537_v7 = vadd.f32 %v536_v5, %v522_v3  ;;  %v501_v8 = vadd.f32 %v791_v21, %v500_v4 }
 0x113   : > { %v502_v10 = vadd.f32 %v501_v8, %v396_v40  ;;  %v538_v11 = vadd.f32 %v537_v7, %v523_v6 }
 0x115   : > { %v539_v12 = vadd.f32 %v538_v11, %v524_v9  ;;  %v503_v13 = vadd.f32 %v502_v10, %v399_v49 }
 0x117   : > { %v504_v16 = vadd.f32 %v794_v38, %v503_v13  ;;  %v540_v18 = vadd.f32 %v539_v12, %v525_v14 }
 0x119   : > { %v505_v20 = vadd.f32 %v795_v45, %v504_v16  ;;  %v541_v22 = vadd.f32 %v540_v18, %v526_v15 }
 0x11b   : > { %v506_v23 = vrot.slane %v505_v20, 4  ;;  %v542_v17 = vadd.f32 %v541_v22, %v527_v19 }
 0x11d   : > { %v507_v24 = vadd.f32 %v506_v23, %v505_v20  ;;  %v543_v25 = vrot.slane %v542_v17, 4 }
 0x11f   : > { %v508_v26 = vrot.slane %v507_v24, 2  ;;  %v544_v21 = vadd.f32 %v543_v25, %v542_v17 }
 0x121   : > { %v509_v27 = vadd.f32 %v508_v26, %v507_v24  ;;  %v545_v28 = vrot.slane %v544_v21, 2 }
 0x123   : > { %v510_v29 = vrot.slane %v509_v27, 1  ;;  %v546_v30 = vadd.f32 %v545_v28, %v544_v21 }
 0x125   : > { %v547_v31 = vrot.slane %v546_v30, 1  ;;  %v511_v32 = vadd.f32 %v510_v29, %v509_v27 }
 0x127   : > { %v548_v33 = vadd.f32 %v547_v31, %v546_v30 }
 0x129   : > { %v550_v34 = vsel %vm549_vm0, %v511_v32, %v548_v33 }
 0x12a   : > { %v552_v35 = vsel %vm551_vm1, %v550_v34, 0.0 }
 0x12b   : > { %553 = vst [vmem:[%s184_s16] sm:$0xff] %v552_v35 }
 0x12c PF: > { %s14_s12 = sadd.s32 1, %s842_s12  }
 0x12d   : > { %p11_p5 = scmp.ge.s32.totalorder %s14_s12, 6  }
 0x12f   :  { %13 = sbr.rel (!%p11_p5) target bundleno = 1 (0x1), region = 70 }

</bundles_post_ra>
